<compile_context>
chip_gen: v5e
topology: v5e:2x2
jax: 0.10.0
libtpu: 0.0.40
codegen_flags: <defaults>
</compile_context>

<pallas_src>
import functools

import jax
import jax.numpy as jnp
from jax.experimental import pallas as pl
from jax.experimental.pallas import tpu as pltpu


def _round_up(v, m):
    return -(-v // m) * m


def _shortcut_kernel(x_ref, sw_ref, o_ref, *, pad, C, use_highest):
    """One grid step processes a slab of `nb` batch images.

    x_ref : (nb, C, H*W)          input slab, lane-dense spatial dim
    sw_ref: (H*W, Ho*Wo)          0/1 selection matrix (stride-2 pick in H and W)
    o_ref : (nb, C_out, Ho*Wo)    output slab, C_out = C + 2*pad, lane-dense
    """
    nb = x_ref.shape[0]
    howo = o_ref.shape[-1]
    out_dtype = o_ref.dtype

    # Channel zero-padding: written directly (no input DMA / compute spent on it),
    # one lane-dense store per band covering the whole slab.
    if pad > 0:
        band = jnp.zeros((nb, pad, howo), dtype=out_dtype)
        o_ref[:, 0:pad, :] = band
        o_ref[:, pad + C:, :] = band

    sw = sw_ref[...]
    precision = jax.lax.Precision.HIGHEST if use_highest else None

    # Per-image 2-D matmul (C, H*W) @ (H*W, Ho*Wo): keeps operands 2-D (no batched
    # dot_general, no sublane-merge reshape of a non-8-aligned C), result is already
    # lane-dense so the store is an unmasked vst.
    def body(b, carry):
        xb = x_ref[b]                                            # (C, H*W)
        sub = jnp.dot(xb, sw, precision=precision,
                      preferred_element_type=jnp.float32)        # (C, Ho*Wo)
        o_ref[b, pad:pad + C, :] = sub.astype(out_dtype)
        return carry

    jax.lax.fori_loop(0, nb, body, 0, unroll=True)


def lambda_layer_shortcut_a(x, planes):
    """Pallas equivalent of
       LambdaLayer(lambda x: F.pad(x[:, :, ::2, ::2],
                                   (0,0,0,0, planes//4, planes//4), "constant", 0))
    """
    N, C, H, W = x.shape
    pad = planes // 4
    C_out = C + 2 * pad
    Ho, Wo = (H + 1) // 2, (W + 1) // 2
    HW, HoWo = H * W, Ho * Wo

    # --- dtype / precision policy -------------------------------------------------
    if x.dtype == jnp.bfloat16:
        sw_dtype = jnp.bfloat16          # single bf16 MXU pass, exact for 0/1 matrix
        use_highest = False
    else:
        sw_dtype = jnp.float32
        use_highest = (x.dtype == jnp.float32)   # multi-pass exact f32 selection

    # --- selection matrix: Sw[h*W+w, ho*Wo+wo] = (h==2*ho) & (w==2*wo) -------------
    hw = jnp.arange(HW)
    h_idx, w_idx = hw // W, hw % W
    oo = jnp.arange(HoWo)
    ho_idx, wo_idx = oo // Wo, oo % Wo
    sw = ((h_idx[:, None] == 2 * ho_idx[None, :]) &
          (w_idx[:, None] == 2 * wo_idx[None, :])).astype(sw_dtype)

    # --- VMEM budgeting from PADDED shapes (sublane->8, lane->128) -----------------
    itemsize = x.dtype.itemsize
    sw_itemsize = jnp.dtype(sw_dtype).itemsize
    in_per_img = _round_up(C, 8) * _round_up(HW, 128) * itemsize
    out_per_img = _round_up(C_out, 8) * _round_up(HoWo, 128) * itemsize
    tmp_per_img = _round_up(C, 8) * _round_up(HoWo, 128) * 4        # f32 matmul result
    sw_bytes = _round_up(HW, 8) * _round_up(HoWo, 128) * sw_itemsize

    try:
        vmem_cap = int(pltpu.get_tpu_info().vmem_capacity_bytes)
    except Exception:
        vmem_cap = 64 * 2**20            # assume smallest (v7x per-core VMEM)

    budget = min(vmem_cap // 3, 40 * 2**20)

    def fits(nb):
        total = (2 * nb * (in_per_img + out_per_img)   # double-buffered blocks
                 + nb * tmp_per_img                    # in-kernel temporaries
                 + 2 * sw_bytes)
        return total <= budget

    # Largest batch-slab nb (divisor of N) that fits the padded budget while keeping
    # >= min(N, 8) grid steps so v7x megacore still gets balanced 'parallel' work.
    min_steps = min(N, 8)
    nb = 1
    for cand in range(1, N + 1):
        if N % cand == 0 and fits(cand) and N // cand >= min_steps:
            nb = cand
    grid = (N // nb,)

    actual = 2 * nb * (in_per_img + out_per_img) + nb * tmp_per_img + 2 * sw_bytes
    vmem_limit = int(min(max(32 * 2**20, actual + 4 * 2**20),
                         max(32 * 2**20, vmem_cap * 3 // 4),
                         64 * 2**20))

    kernel = functools.partial(_shortcut_kernel, pad=pad, C=C, use_highest=use_highest)

    in_bytes = N * C * HW * itemsize + HW * HoWo * sw_itemsize
    out_bytes = N * C_out * HoWo * itemsize

    out_flat = pl.pallas_call(
        kernel,
        out_shape=jax.ShapeDtypeStruct((N, C_out, HoWo), x.dtype),
        grid=grid,
        in_specs=[
            pl.BlockSpec((nb, C, HW), lambda i: (i, 0, 0)),      # lane-dense input
            pl.BlockSpec((HW, HoWo), lambda i: (0, 0)),          # selection matrix
        ],
        out_specs=pl.BlockSpec((nb, C_out, HoWo), lambda i: (i, 0, 0)),  # lane-dense out
        compiler_params=pltpu.CompilerParams(
            dimension_semantics=("parallel",),   # v7x: shard batch slabs across TCs
            vmem_limit_bytes=vmem_limit,
        ),
        cost_estimate=pl.CostEstimate(
            flops=2 * N * C * HW * HoWo,
            transcendentals=0,
            bytes_accessed=in_bytes + out_bytes,
        ),
    )(x.reshape(N, C, HW), sw)

    # Free, contiguous un-flatten back to NCHW.
    return out_flat.reshape(N, C_out, Ho, Wo)


class LambdaLayer:
    """JAX/Pallas mirror of the PyTorch LambdaLayer: just applies self.lambd."""

    def __init__(self, lambd):
        self.lambd = lambd

    def __call__(self, x):
        return self.lambd(x)


if __name__ == "__main__":
    # Small deterministic example: N=2, C=4, H=W=16, planes=8 (option-A shortcut for a
    # 2x channel expansion) => pad = 2 channels each side, output shape (2, 8, 8, 8).
    key = jax.random.PRNGKey(0)
    N, C, H, W = 2, 4, 16, 16
    planes = 2 * C
    x = jax.random.normal(key, (N, C, H, W), dtype=jnp.float32)

    layer = LambdaLayer(lambda t: lambda_layer_shortcut_a(t, planes))
    out = jax.block_until_ready(layer(x))

    # Pure-JAX reference of the PyTorch lambda semantics.
    pad = planes // 4
    ref = jnp.pad(
        x[:, :, ::2, ::2],
        ((0, 0), (pad, pad), (0, 0), (0, 0)),
        mode="constant",
        constant_values=0.0,
    )

    assert out.shape == ref.shape, (out.shape, ref.shape)
    assert jnp.allclose(out, ref, atol=1e-6), "mismatch vs reference"
    print("KERNEL_OK")
</pallas_src>

<mosaic_0001>
module attributes {stable_mosaic.version = 11 : i64} {
  func.func @_shortcut_kernel(%arg0: i32, %arg1: memref<1x4x256xf32, #tpu.memory_space<vmem>>, %arg2: memref<256x64xf32, #tpu.memory_space<vmem>>, %arg3: memref<1x8x64xf32, #tpu.memory_space<vmem>>) attributes {dimension_semantics = [#tpu.dimension_semantics<parallel>], iteration_bounds = array<i64: 2>, scalar_prefetch = 0 : i64, scratch_operands = 0 : i64, tpu.core_type = #tpu.core_type<tc>, window_params = [{transform_indices = @transform_0, window_bounds = array<i64: 1, 4, 256>}, {pipeline_mode = #tpu.pipeline_mode<synchronous>, transform_indices = @transform_1, window_bounds = array<i64: 256, 64>}, {transform_indices = @transform_2, window_bounds = array<i64: 1, 8, 64>}]} {
    %cst = arith.constant 0.000000e+00 : f32
    %0 = vector.broadcast %cst : f32 to vector<1x2x64xf32>
    %c0 = arith.constant 0 : index
    %c0_0 = arith.constant 0 : index
    %c0_1 = arith.constant 0 : index
    %1 = vector.load %arg3[%c0, %c0_0, %c0_1] : memref<1x8x64xf32, #tpu.memory_space<vmem>>, vector<1x2x64xf32>
    tpu.vector_store %arg3[%c0, %c0_0, %c0_1], %0 {strides = array<i32>} : memref<1x8x64xf32, #tpu.memory_space<vmem>>, vector<1x2x64xf32>,
    %c0_2 = arith.constant 0 : index
    %c6 = arith.constant 6 : index
    %c0_3 = arith.constant 0 : index
    %2 = vector.load %arg3[%c0_2, %c6, %c0_3] : memref<1x8x64xf32, #tpu.memory_space<vmem>>, vector<1x2x64xf32>
    tpu.vector_store %arg3[%c0_2, %c6, %c0_3], %0 {strides = array<i32>} : memref<1x8x64xf32, #tpu.memory_space<vmem>>, vector<1x2x64xf32>,
    %c0_4 = arith.constant 0 : index
    %c0_5 = arith.constant 0 : index
    %3 = vector.load %arg2[%c0_4, %c0_5] : memref<256x64xf32, #tpu.memory_space<vmem>>, vector<256x64xf32>
    %c0_i32 = arith.constant 0 : i32
    %4 = arith.index_cast %c0_i32 : i32 to index
    %c0_6 = arith.constant 0 : index
    %c0_7 = arith.constant 0 : index
    %5 = vector.load %arg1[%4, %c0_6, %c0_7] : memref<1x4x256xf32, #tpu.memory_space<vmem>>, vector<1x4x256xf32>
    %6 = vector.shape_cast %5 : vector<1x4x256xf32> to vector<4x256xf32>
    %cst_8 = arith.constant dense<0.000000e+00> : vector<4x64xf32>
    %7 = tpu.matmul %6, %3, %cst_8 {dimension_numbers = #tpu.dot_dimension_numbers<[1], [0], [0], [1], [0, 0, 1, 1], [], []>, precision = #tpu.contract_precision<fp32>} : vector<4x256xf32>, vector<256x64xf32>, vector<4x64xf32> -> vector<4x64xf32>
    %8 = arith.index_cast %c0_i32 : i32 to index
    %c2 = arith.constant 2 : index
    %c0_9 = arith.constant 0 : index
    %9 = vector.load %arg3[%8, %c2, %c0_9] : memref<1x8x64xf32, #tpu.memory_space<vmem>>, vector<1x4x64xf32>
    %10 = vector.shape_cast %9 : vector<1x4x64xf32> to vector<4x64xf32>
    %11 = vector.shape_cast %7 : vector<4x64xf32> to vector<1x4x64xf32>
    tpu.vector_store %arg3[%8, %c2, %c0_9], %11 {strides = array<i32>} : memref<1x8x64xf32, #tpu.memory_space<vmem>>, vector<1x4x64xf32>,
    %c1_i32 = arith.constant 1 : i32
    return
  }
  func.func @transform_0(%arg0: i32) -> (i32, i32, i32) {
    %c0_i32 = arith.constant 0 : i32
    %c0_i32_0 = arith.constant 0 : i32
    %c0_i32_1 = arith.constant 0 : i32
    return %arg0, %c0_i32, %c0_i32_0 : i32, i32, i32
  }
  func.func @transform_1(%arg0: i32) -> (i32, i32) {
    %c0_i32 = arith.constant 0 : i32
    %c0_i32_0 = arith.constant 0 : i32
    %c0_i32_1 = arith.constant 0 : i32
    return %c0_i32, %c0_i32_0 : i32, i32
  }
  func.func @transform_2(%arg0: i32) -> (i32, i32, i32) {
    %c0_i32 = arith.constant 0 : i32
    %c0_i32_0 = arith.constant 0 : i32
    %c0_i32_1 = arith.constant 0 : i32
    return %arg0, %c0_i32, %c0_i32_0 : i32, i32, i32
  }
}

</mosaic_0001>

<bundles_post_ra>
// kernel: tpu_custom_call.1
= control target key start
LH: loop header
LB: loop body
LE: loop exit
PB: predicated region body
PF: predicated region fallthrough
CT: control target
= control target key end

     0   :  { %7 = vsyncpa [#allocation3], 0  ;;  %s1777_s0 = inlined_call_operand.vmem [shape: f32[2,4,256], index: 0, kind: input, shape index: {}]   ;;  %s1778_s1 = inlined_call_operand.vmem [shape: f32[256,64], index: 1, kind: input, shape index: {}]   ;;  %s1779_s2 = inlined_call_operand.hbm [shape: f32[2,8,64], index: 2, kind: output, shape index: {}]  }
   0x1   :  { %9 = vsyncpa [#allocation3 + $0x1], 0  ;;  %s1075_s9 = smov 0   ;;  %s1077_s10 = smov 0  }
   0x2   :  { %s1079_s11 = smov 0   ;;  %s1081_s12 = smov 0  }
   0x3 LB: > { %s1096_s13 = sadd.s32 4294967295, %s1057_s12   ;;  %s943_s14 = sadd.s32 4294967294, %s1057_s12   ;;  %s1057_s12 = sphi %s1081_s12, %s1839_s12   ;;  %s1053_s11 = sphi %s1079_s11, %s1838_s11   ;;  %s1049_s10 = sphi %s1077_s10, %s1837_s10   ;;  %s1045_s9 = sphi %s1075_s9, %s1836_s9  }
   0x4   : > { %s1100_s15 = sadd.s32 1, %s1057_s12   ;;  %s69_s16 = sadd.s32 1, %s1053_s11 }
   0x5   : > { %s66_s17 = ssub.s32 %s1057_s12, %s1100_s15  ;;  %p79_p0 = scmp.ne.s32.totalorder %s1053_s11, %s1049_s10 }
   0x6   : > { %p67_p1 = scmp.eq.s32.totalorder %s66_s17, 0  ;;  %p80_p2 = scmp.eq.s32.totalorder %s1096_s13, 1 }
   0x7   : > { %p85_p3 = scmp.ne.s32.totalorder %s1049_s10, %s1045_s9  ;;  %p86_p4 = scmp.eq.s32.totalorder %s943_s14, 1 }
   0x8   : > { %s1111_s18 = scalar_select %p67_p1, %s1053_s11, %s69_s16  }
   0x9   : > { %p1113_p5 = por %p80_p2, %p79_p0  ;;  %p1117_p6 = por %p86_p4, %p85_p3 }
   0xa   : > { %p946_p7 = scmp.ge.s32.totalorder %s1057_s12, 1  ;;  %p115_p8 = scmp.lt.s32.totalorder %s1057_s12, 3 }
   0xc   : > { %p116_p9 = pnand %p946_p7, %p115_p8 }
   0xe   : > { %119 = sbr.rel (%p116_p9) target bundleno = 263 (0x107), region = 28 }
  0x13   : > { %v160_v0 = vld [vmem:[%s1778_s1 + $0x78] sm:$0xff]  ;;  %v159_v1 = vld [vmem:[%s1778_s1 + $0x70] sm:$0xff]  ;;  %v158_v2 = vld [vmem:[%s1778_s1 + $0x68] sm:$0xff]  ;;  %p137_p10 = scmp.lt.s32.totalorder %s1096_s13, 1  ;;  %s134_s5 = sand.u32 1, %s1049_s10   ;;  %vm142_vm0 = vcmask 517120  }
  0x14   : > { %v1133_v3 = vand.u32 4294901760, %v160_v0  ;;  %v1135_v4 = vand.u32 4294901760, %v159_v1  ;;  %v1137_v5 = vand.u32 4294901760, %v158_v2  ;;  %v157_v6 = vld [vmem:[%s1778_s1 + $0x60] sm:$0xff]  ;;  %v156_v7 = vld [vmem:[%s1778_s1 + $0x58] sm:$0xff]  ;;  %v155_v8 = vld [vmem:[%s1778_s1 + $0x50] sm:$0xff] }
  0x15   : > { %v1148_v9 = vand.u32 4294901760, %v157_v6  ;;  %v1150_v10 = vand.u32 4294901760, %v156_v7  ;;  %v1152_v11 = vand.u32 4294901760, %v155_v8  ;;  %v154_v12 = vld [vmem:[%s1778_s1 + $0x48] sm:$0xff]  ;;  %v153_v13 = vld [vmem:[%s1778_s1 + $0x40] sm:$0xff]  ;;  %v152_v18 = vld [vmem:[%s1778_s1 + $0x38] sm:$0xff] }
  0x16   : > { %185 = vmatpush.msra.mxu0 %v1133_v3  ;;  %v1162_v14 = vsub.f32 %v160_v0, %v1133_v3  ;;  %v1165_v15 = vsub.f32 %v159_v1, %v1135_v4  ;;  %381 = vmatpush.msra.mxu3 %v1133_v3  ;;  %v1169_v16 = vsub.f32 %v158_v2, %v1137_v5  ;;  %v1171_v17 = vand.u32 4294901760, %v154_v12  ;;  %s1188_s17 = scalar_select %p137_p10, %s1096_s13, 1  ;;  %v151_v26 = vld [vmem:[%s1778_s1 + $0x30] sm:$0xff]  ;;  %v150_v34 = vld [vmem:[%s1778_s1 + $0x28] sm:$0xff]  ;;  %v149_v42 = vld [vmem:[%s1778_s1 + $0x20] sm:$0xff] }
  0x17   : > { %v1177_v19 = vsub.f32 %v157_v6, %v1148_v9  ;;  %v1180_v20 = vsub.f32 %v156_v7, %v1150_v10  ;;  %v1183_v21 = vsub.f32 %v155_v8, %v1152_v11  ;;  %v1195_v25 = vand.u32 4294901760, %v153_v13  ;;  %v148_v48 = vld [vmem:[%s1778_s1 + $0x18] sm:$0xff]  ;;  %v147_v54 = vld [vmem:[%s1778_s1 + $0x10] sm:$0xff]  ;;  %v146_v62 = vld [vmem:[%s1778_s1 + $0x8] sm:$0xff]  ;;  %s947_s6 = sshll.u32 %s134_s5, 3  ;;  %s951_s8 = sshll.u32 %s1096_s13, 3 }
  0x18   : > { %187 = vmatpush.msra.mxu0 %v1135_v4  ;;  %328 = vmatpush.msra.mxu2 %v1162_v14  ;;  %v227_v22 = vand.u32 4294901760, %v1162_v14  ;;  %v1795_v23 = vand.u32 4294901760, %v1165_v15  ;;  %v1793_v24 = vand.u32 4294901760, %v1169_v16  ;;  %v1202_v28 = vand.u32 4294901760, %v152_v18  ;;  %s954_s25 = sshll.u32 %s1188_s17, 3  ;;  %v176_v60 = vld [vmem:[%s1778_s1 + $0xf8] sm:$0xff]  ;;  %s879_s17 = scalar_lea.hbm %s1779_s2, %s951_s8 }
  0x19   : > { %383 = vmatpush.msra.mxu3 %v1135_v4  ;;  %v1791_v27 = vand.u32 4294901760, %v1177_v19  ;;  %v1205_v29 = vsub.f32 %v154_v12, %v1171_v17  ;;  %v1789_v33 = vand.u32 4294901760, %v1180_v20  ;;  %v1223_v35 = vand.u32 4294901760, %v151_v26  ;;  %s141_s30 = scalar_lea.vmem %s1777_s0, %s954_s25  ;;  %v145_v6 = vld [vmem:[%s1778_s1] sm:$0xff]  ;;  %v175_v7 = vld [vmem:[%s1778_s1 + $0xf0] sm:$0xff]  ;;  %s1738_s7 = scalar_lea.vmem [#allocation2], %s947_s6 }
  0x1a   : > { %189 = vmatpush.msra.mxu0 %v1137_v5  ;;  %331 = vmatpush.msra.mxu2 %v1165_v15  ;;  %v228_v30 = vsub.f32 %v1162_v14, %v227_v22  ;;  %v234_v31 = vsub.f32 %v1165_v15, %v1795_v23  ;;  %v240_v32 = vsub.f32 %v1169_v16, %v1793_v24  ;;  %v1788_v36 = vand.u32 4294901760, %v1183_v21  ;;  %v177_v55 = vld [vmem:[%s141_s30] sm:$0xff]  ;;  %s881_s21 = sshll.u32 %s1738_s7, 4  ;;  %s883_s22 = sshll.u32 %s879_s17, 4  ;;  %s882_s21 = int_to_ptr.vmem [resolvable:$true] %s881_s21  ;;  %s884_s22 = int_to_ptr.hbm [resolvable:$true] %s883_s22 }
  0x1b   : > { %385 = vmatpush.msra.mxu3 %v1137_v5  ;;  %v246_v39 = vsub.f32 %v1177_v19, %v1791_v27  ;;  %v1233_v40 = vsub.f32 %v153_v13, %v1195_v25  ;;  %v1236_v41 = vand.u32 4294901760, %v150_v34  ;;  %v252_v44 = vsub.f32 %v1180_v20, %v1789_v33  ;;  %179 = vst [vmem:[#allocation1] ss:$2 sm:$0xff] %v177_v55  ;;  %s869_s13 = scalar_lea.sflag [#allocation3], %s134_s5  ;;  %s1009_s23 = sshra.s32 %s884_s22, 4  ;;  %s1010_s23 = int_to_ptr.hbm [resolvable:$true] %s1009_s23 }
  0x1c   : > { %191 = vmatpush.msra.mxu0 %v1148_v9  ;;  %v229_v37 = vand.u32 4294901760, %v228_v30  ;;  %334 = vmatpush.msra.mxu2 %v1169_v16  ;;  %v235_v38 = vand.u32 4294901760, %v234_v31  ;;  %v241_v43 = vand.u32 4294901760, %v240_v32  ;;  %v1786_v45 = vand.u32 4294901760, %v1205_v29  ;;  %s1011_s24 = scalar_lea.hbm %s1010_s23, 8  ;;  %s1015_s27 = scalar_lea.hbm %s1779_s2, 16 }
  0x1d   : > { %387 = vmatpush.msra.mxu3 %v1148_v9  ;;  %v1247_v46 = vsub.f32 %v152_v18, %v1202_v28  ;;  %v258_v47 = vsub.f32 %v1183_v21, %v1788_v36  ;;  %v247_v49 = vand.u32 4294901760, %v246_v39  ;;  %v1261_v50 = vand.u32 4294901760, %v149_v42  ;;  %p1012_p11 = scmp.ne.s32.totalorder %s1010_s23, %s1011_s24  ;;  %p1016_p0 = scmp.lt.s32.totalorder %s1010_s23, %s1779_s2 }
  0x1e   : > { %193 = vmatpush.msra.mxu0 %v1150_v10  ;;  %230 = vmatpush.msra.mxu1 %v229_v37  ;;  %v1785_v51 = vand.u32 4294901760, %v1233_v40  ;;  %v1265_v52 = vsub.f32 %v151_v26, %v1223_v35  ;;  %v1270_v53 = vsub.f32 %v150_v34, %v1236_v41  ;;  %v253_v56 = vand.u32 4294901760, %v252_v44  ;;  %v174_v34 = vld [vmem:[%s1778_s1 + $0xe8] sm:$0xff]  ;;  %p1017_p1 = scmp.lt.s32.totalorder %s1015_s27, %s1011_s24 }
  0x1f   : > { %337 = vmatpush.msra.mxu2 %v1177_v19  ;;  %389 = vmatpush.msra.mxu3 %v1150_v10  ;;  %v264_v57 = vsub.f32 %v1205_v29, %v1786_v45  ;;  %v1279_v58 = vand.u32 4294901760, %v148_v48  ;;  %v1784_v59 = vand.u32 4294901760, %v1247_v46  ;;  %v259_v61 = vand.u32 4294901760, %v258_v47  ;;  %v173_v47 = vld [vmem:[%s1778_s1 + $0xe0] sm:$0xff]  ;;  %p1013_p12 = pnand %p1012_p11, %p1113_p5 }
  0x20   : > { %195 = vmatpush.msra.mxu0 %v1152_v11  ;;  %236 = vmatpush.msra.mxu1 %v235_v38  ;;  %v270_v63 = vsub.f32 %v1233_v40, %v1785_v51  ;;  %v1294_v0 = vand.u32 4294901760, %v147_v54  ;;  %v1782_v1 = vand.u32 4294901760, %v1265_v52  ;;  %v1298_v2 = vsub.f32 %v149_v42, %v1261_v50  ;;  %v169_v45 = vld [vmem:[%s1778_s1 + $0xc0] sm:$0xff]  ;;  %p1018_p2 = por %p1017_p1, %p1016_p0 }
  0x21   : > { %340 = vmatpush.msra.mxu2 %v1180_v20  ;;  %391 = vmatpush.msra.mxu3 %v1152_v11  ;;  %v1781_v8 = vand.u32 4294901760, %v1270_v53  ;;  %v1309_v12 = vand.u32 4294901760, %v176_v60  ;;  %v265_v13 = vand.u32 4294901760, %v264_v57  ;;  %v276_v18 = vsub.f32 %v1247_v46, %v1784_v59  ;;  %p1014_p13 = pneg %p1013_p12 }
  0x22   : > { %197 = vmatpush.msra.mxu0 %v1171_v17  ;;  %242 = vmatpush.msra.mxu1 %v241_v43  ;;  %v1315_v26 = vand.u32 4294901760, %v146_v62  ;;  %v1318_v30 = vsub.f32 %v148_v48, %v1279_v58  ;;  %v1322_v31 = vand.u32 4294901760, %v145_v6  ;;  %v1324_v32 = vand.u32 4294901760, %v175_v7 }
  0x23   : > { %343 = vmatpush.msra.mxu2 %v1183_v21  ;;  %393 = vmatpush.msra.mxu3 %v1171_v17  ;;  %v271_v37 = vand.u32 4294901760, %v270_v63  ;;  %v282_v38 = vsub.f32 %v1265_v52, %v1782_v1  ;;  %v1780_v39 = vand.u32 4294901760, %v1298_v2  ;;  %v1335_v42 = vsub.f32 %v147_v54, %v1294_v0  ;;  %p1019_p3 = pnand %p1018_p2, %p1014_p13 }
  0x24   : > { %199 = vmatpush.msra.mxu0 %v1195_v25  ;;  %248 = vmatpush.msra.mxu1 %v247_v49  ;;  %v288_v43 = vsub.f32 %v1270_v53, %v1781_v8  ;;  %v1343_v44 = vsub.f32 %v176_v60, %v1309_v12  ;;  %v277_v48 = vand.u32 4294901760, %v276_v18  ;;  %v1783_v49 = vand.u32 4294901760, %v1318_v30  ;;  %v172_v60 = vld [vmem:[%s1778_s1 + $0xd8] sm:$0xff]  ;;  %v171_v18 = vld [vmem:[%s1778_s1 + $0xd0] sm:$0xff]  ;;  %v170_v8 = vld [vmem:[%s1778_s1 + $0xc8] sm:$0xff] }
  0x25   : > { %346 = vmatpush.msra.mxu2 %v1205_v29  ;;  %395 = vmatpush.msra.mxu3 %v1195_v25  ;;  %v1351_v54 = vsub.f32 %v146_v62, %v1315_v26  ;;  %v1353_v55 = vand.u32 4294901760, %v174_v34  ;;  %v1361_v57 = vsub.f32 %v175_v7, %v1324_v32  ;;  %v294_v62 = vsub.f32 %v1298_v2, %v1780_v39 }
  0x26   : > { %201 = vmatpush.msra.mxu0 %v1202_v28  ;;  %254 = vmatpush.msra.mxu1 %v253_v56  ;;  %v1358_v56 = vsub.f32 %v145_v6, %v1322_v31  ;;  %v1787_v63 = vand.u32 4294901760, %v1335_v42  ;;  %v289_v6 = vand.u32 4294901760, %v288_v43  ;;  %v1790_v7 = vand.u32 4294901760, %v1343_v44 }
  0x27   : > { %349 = vmatpush.msra.mxu2 %v1233_v40  ;;  %397 = vmatpush.msra.mxu3 %v1202_v28  ;;  %1806 = vst [vmem:[#allocation5_spill] sm:$0xff] %v1353_v55  ;;  %v1385_v39 = vsub.f32 %v174_v34, %v1353_v55  ;;  %v1387_v43 = vand.u32 4294901760, %v172_v60  ;;  %v1794_v1 = vand.u32 4294901760, %v1361_v57  ;;  %v1403_v51 = vand.u32 4294901760, %v171_v18 }
  0x28   : > { %203 = vmatpush.msra.mxu0 %v1223_v35  ;;  %260 = vmatpush.msra.mxu1 %v259_v61  ;;  %v283_v61 = vand.u32 4294901760, %v282_v38  ;;  %v1792_v38 = vand.u32 4294901760, %v1351_v54  ;;  %v306_v34 = vsub.f32 %v1335_v42, %v1787_v63  ;;  %v1428_v27 = vand.u32 4294901760, %v169_v45 }
  0x29   : > { %352 = vmatpush.msra.mxu2 %v1247_v46  ;;  %399 = vmatpush.msra.mxu3 %v1223_v35  ;;  %v1797_v36 = vand.u32 4294901760, %v1385_v39  ;;  %v1421_v33 = vsub.f32 %v172_v60, %v1387_v43  ;;  %v1439_v24 = vsub.f32 %v171_v18, %v1403_v51  ;;  %vm866_vm1 = vcmask 519168  }
  0x2a   : > { %205 = vmatpush.msra.mxu0 %v1236_v41  ;;  %266 = vmatpush.msra.mxu1 %v265_v13  ;;  %v1371_v13 = vand.u32 4294901760, %v173_v47  ;;  %v312_v63 = vsub.f32 %v1351_v54, %v1792_v38 }
  0x2b   : > { %355 = vmatpush.msra.mxu2 %v1265_v52  ;;  %401 = vmatpush.msra.mxu3 %v1236_v41  ;;  %v581_v18 = vsub.f32 %v1385_v39, %v1797_v36  ;;  %v1799_v14 = vand.u32 4294901760, %v1421_v33 }
  0x2c   : > { %207 = vmatpush.msra.mxu0 %v1261_v50  ;;  %272 = vmatpush.msra.mxu1 %v271_v37  ;;  %v300_v37 = vsub.f32 %v1318_v30, %v1783_v49  ;;  %v295_v49 = vand.u32 4294901760, %v294_v62  ;;  %v1401_v59 = vsub.f32 %v173_v47, %v1371_v13  ;;  %v1413_v62 = vand.u32 4294901760, %v170_v8 }
  0x2d   : > { %358 = vmatpush.msra.mxu2 %v1270_v53  ;;  %403 = vmatpush.msra.mxu3 %v1261_v50 }
  0x2e   : > { %209 = vmatpush.msra.mxu0 %v1279_v58  ;;  %278 = vmatpush.msra.mxu1 %v277_v48  ;;  %v1796_v48 = vand.u32 4294901760, %v1358_v56  ;;  %v301_v47 = vand.u32 4294901760, %v300_v37  ;;  %v307_v37 = vand.u32 4294901760, %v306_v34  ;;  %v1798_v38 = vand.u32 4294901760, %v1401_v59 }
  0x2f   : > { %361 = vmatpush.msra.mxu2 %v1298_v2  ;;  %405 = vmatpush.msra.mxu3 %v1279_v58  ;;  %v1445_v23 = vsub.f32 %v170_v8, %v1413_v62  ;;  %v313_v34 = vand.u32 4294901760, %v312_v63  ;;  %v166_v63 = vld [vmem:[%s1778_s1 + $0xa8] sm:$0xff] }
  0x30   : > { %211 = vmatpush.msra.mxu0 %v1294_v0  ;;  %284 = vmatpush.msra.mxu1 %v283_v61  ;;  %v569_v61 = vsub.f32 %v1343_v44, %v1790_v7  ;;  %v575_v7 = vsub.f32 %v1361_v57, %v1794_v1  ;;  %v318_v60 = vsub.f32 %v1358_v56, %v1796_v48 }
  0x31   : > { %364 = vmatpush.msra.mxu2 %v1318_v30  ;;  %407 = vmatpush.msra.mxu3 %v1294_v0  ;;  %v1461_v48 = vsub.f32 %v169_v45, %v1428_v27  ;;  %v587_v36 = vsub.f32 %v1401_v59, %v1798_v38  ;;  %v593_v38 = vsub.f32 %v1421_v33, %v1799_v14  ;;  %v1810_v14 = vand.u32 4294901760, %v1439_v24 }
  0x32   : > { %213 = vmatpush.msra.mxu0 %v1315_v26  ;;  %290 = vmatpush.msra.mxu1 %v289_v6  ;;  %v168_v6 = vld [vmem:[%s1778_s1 + $0xb8] sm:$0xff]  ;;  %v570_v1 = vand.u32 4294901760, %v569_v61  ;;  %v1807_v61 = vand.u32 4294901760, %v1165_v15  ;;  %v576_v8 = vand.u32 4294901760, %v575_v7  ;;  %v1808_v7 = vand.u32 4294901760, %v1169_v16 }
  0x33   : > { %367 = vmatpush.msra.mxu2 %v1335_v42  ;;  %409 = vmatpush.msra.mxu3 %v1315_v26  ;;  %v1486_v16 = vand.u32 4294901760, %v166_v63 }
  0x34   : > { %215 = vmatpush.msra.mxu0 %v1322_v31  ;;  %296 = vmatpush.msra.mxu1 %v295_v49  ;;  %v167_v49 = vld [vmem:[%s1778_s1 + $0xb0] sm:$0xff] }
  0x35   : > { %370 = vmatpush.msra.mxu2 %v1351_v54  ;;  %411 = vmatpush.msra.mxu3 %v1322_v31 }
  0x36   : > { %422 = vmatpush.msrb.mxu0 %v227_v22  ;;  %302 = vmatpush.msra.mxu1 %v301_v47  ;;  %v1455_v22 = vand.u32 4294901760, %v168_v6  ;;  %v319_v47 = vand.u32 4294901760, %v318_v60  ;;  %v582_v60 = vand.u32 4294901760, %v581_v18  ;;  %v588_v18 = vand.u32 4294901760, %v587_v36 }
  0x37   : > { %373 = vmatpush.msra.mxu2 %v1358_v56  ;;  %571 = vmatpush.msrb.mxu3 %v570_v1  ;;  %v1809_v1 = vand.u32 4294901760, %v1177_v19  ;;  %v594_v36 = vand.u32 4294901760, %v593_v38  ;;  %v163_v38 = vld [vmem:[%s1778_s1 + $0x90] sm:$0xff] }
  0x38   : > { %426 = vmatpush.msrb.mxu0 %v1807_v61  ;;  %308 = vmatpush.msra.mxu1 %v307_v37  ;;  %v1471_v61 = vand.u32 4294901760, %v167_v49  ;;  %v165_v37 = vld [vmem:[%s1778_s1 + $0xa0] sm:$0xff]  ;;  %v1484_v15 = vsub.f32 %v168_v6, %v1455_v22  ;;  %v599_v6 = vsub.f32 %v1439_v24, %v1810_v14 }
  0x39   : > { %526 = vmatpush.msrb.mxu2 %v1309_v12  ;;  %577 = vmatpush.msrb.mxu3 %v576_v8  ;;  %v1501_v19 = vand.u32 4294901760, %v165_v37  ;;  %v1811_v8 = vand.u32 4294901760, %v1180_v20  ;;  %v1813_v20 = vand.u32 4294901760, %v1183_v21 }
  0x3a   : > { %430 = vmatpush.msrb.mxu0 %v1808_v7  ;;  %314 = vmatpush.msra.mxu1 %v313_v34  ;;  %v164_v34 = vld [vmem:[%s1778_s1 + $0x98] sm:$0xff]  ;;  %v1499_v45 = vsub.f32 %v167_v49, %v1471_v61  ;;  %v180_v7 = vld.sshfl [vmem:[#allocation1] sm:$0xff pattern:$0x75316420]  ;;  %v1802_v14 = vand.u32 4294901760, %v1484_v15  ;;  %v1512_v49 = vsub.f32 %v166_v63, %v1486_v16  ;;  %v600_v63 = vand.u32 4294901760, %v599_v6 }
  0x3b   : > { %528 = vmatpush.msrb.mxu2 %v1324_v32  ;;  %583 = vmatpush.msrb.mxu3 %v582_v60  ;;  %v1530_v21 = vand.u32 4294901760, %v180_v7  ;;  %v1543_v6 = vand.u32 4294901760, %v163_v38 }
  0x3c   : > { %434 = vmatpush.msrb.mxu0 %v1809_v1  ;;  %320 = vmatpush.msra.mxu1 %v319_v47  ;;  %v1812_v1 = vand.u32 4294901760, %v1445_v23  ;;  %v1803_v60 = vand.u32 4294901760, %v1499_v45 }
  0x3d   : > { %530 = vmatpush.msrb.mxu2 %v1353_v55  ;;  %v1514_v55 = vand.u32 4294901760, %v164_v34  ;;  %589 = vmatpush.msrb.mxu3 %v588_v18  ;;  %v628_v18 = vand.u32 4294901760, %v1512_v49 }
  0x3e   : > { %438 = vmatpush.msrb.mxu0 %v1811_v8  ;;  %489 = vmatpush.msrb.mxu1 %v1133_v3  ;;  %v605_v47 = vsub.f32 %v1445_v23, %v1812_v1  ;;  %v1814_v3 = vand.u32 4294901760, %v1461_v48  ;;  %v1528_v1 = vsub.f32 %v165_v37, %v1501_v19  ;;  %v617_v37 = vsub.f32 %v1484_v15, %v1802_v14 }
  0x3f   : > { %532 = vmatpush.msrb.mxu2 %v1371_v13  ;;  %595 = vmatpush.msrb.mxu3 %v594_v36  ;;  %v623_v36 = vsub.f32 %v1499_v45, %v1803_v60  ;;  %v1557_v14 = vsub.f32 %v180_v7, %v1530_v21  ;;  %v629_v7 = vsub.f32 %v1512_v49, %v628_v18  ;;  %v1818_v60 = vand.u32 4294901760, %v1265_v52 }
  0x40   : > { %442 = vmatpush.msrb.mxu0 %v1813_v20  ;;  %491 = vmatpush.msrb.mxu1 %v1135_v4  ;;  %v611_v8 = vsub.f32 %v1461_v48, %v1814_v3  ;;  %v1815_v4 = vand.u32 4294901760, %v1205_v29  ;;  %v606_v20 = vand.u32 4294901760, %v605_v47  ;;  %v162_v3 = vld [vmem:[%s1778_s1 + $0x88] sm:$0xff]  ;;  %v1546_v29 = vsub.f32 %v164_v34, %v1514_v55 }
  0x41   : > { %534 = vmatpush.msrb.mxu2 %v1387_v43  ;;  %601 = vmatpush.msrb.mxu3 %v600_v63  ;;  %v1559_v34 = vand.u32 4294901760, %v162_v3  ;;  %v1819_v52 = vand.u32 4294901760, %v1270_v53 }
  0x42   : > { %446 = vmatpush.msrb.mxu0 %v1815_v4  ;;  %493 = vmatpush.msrb.mxu1 %v1137_v5  ;;  %v1816_v5 = vand.u32 4294901760, %v1233_v40  ;;  %v612_v47 = vand.u32 4294901760, %v611_v8  ;;  %v634_v4 = vand.u32 4294901760, %v1528_v1  ;;  %v161_v40 = vld [vmem:[%s1778_s1 + $0x80] sm:$0xff]  ;;  %v618_v8 = vand.u32 4294901760, %v617_v37 }
  0x43   : > { %536 = vmatpush.msrb.mxu2 %v1403_v51  ;;  %607 = vmatpush.msrb.mxu3 %v606_v20  ;;  %v640_v63 = vand.u32 4294901760, %v1546_v29  ;;  %v218_v37 = vand.u32 4294901760, %v1557_v14 }
  0x44   : > { %450 = vmatpush.msrb.mxu0 %v1816_v5  ;;  %495 = vmatpush.msrb.mxu1 %v1148_v9  ;;  %v1817_v9 = vand.u32 4294901760, %v1247_v46  ;;  %v1573_v5 = vsub.f32 %v163_v38, %v1543_v6  ;;  %v1578_v46 = vand.u32 4294901760, %v161_v40  ;;  %v635_v20 = vsub.f32 %v1528_v1, %v634_v4 }
  0x45   : > { %538 = vmatpush.msrb.mxu2 %v1413_v62  ;;  %613 = vmatpush.msrb.mxu3 %v612_v47  ;;  %v1586_v38 = vsub.f32 %v162_v3, %v1559_v34  ;;  %v641_v47 = vsub.f32 %v1546_v29, %v640_v63  ;;  %v219_v3 = vsub.f32 %v1557_v14, %v218_v37 }
  0x46   : > { %454 = vmatpush.msrb.mxu0 %v1817_v9  ;;  %497 = vmatpush.msrb.mxu1 %v1150_v10  ;;  %v624_v10 = vand.u32 4294901760, %v623_v36  ;;  %v646_v36 = vand.u32 4294901760, %v1573_v5  ;;  %v1820_v9 = vand.u32 4294901760, %v1298_v2  ;;  %v1600_v53 = vsub.f32 %v161_v40, %v1578_v46 }
  0x47   : > { %540 = vmatpush.msrb.mxu2 %v1428_v27  ;;  %619 = vmatpush.msrb.mxu3 %v618_v8  ;;  %v652_v8 = vand.u32 4294901760, %v1586_v38  ;;  %v1822_v40 = vand.u32 4294901760, %v1335_v42  ;;  %v1824_v42 = vand.u32 4294901760, %v1358_v56 }
  0x48   : > { %458 = vmatpush.msrb.mxu0 %v1818_v60  ;;  %499 = vmatpush.msrb.mxu1 %v1152_v11  ;;  %v181_v11 = vld.sshfl [vmem:[#allocation1 + $0x8] sm:$0xff pattern:$0x75316420]  ;;  %v630_v60 = vand.u32 4294901760, %v629_v7  ;;  %v647_v2 = vsub.f32 %v1573_v5, %v646_v36 }
  0x49   : > { %542 = vmatpush.msrb.mxu2 %v1455_v22  ;;  %625 = vmatpush.msrb.mxu3 %v624_v10  ;;  %v1605_v7 = vand.u32 4294901760, %v181_v11  ;;  %v658_v10 = vand.u32 4294901760, %v1600_v53 }
  0x4a   : > { %462 = vmatpush.msrb.mxu0 %v1819_v52  ;;  %501 = vmatpush.msrb.mxu1 %v1171_v17  ;;  %v636_v17 = vand.u32 4294901760, %v635_v20  ;;  %v1821_v52 = vand.u32 4294901760, %v1318_v30  ;;  %v220_v30 = vand.u32 4294901760, %v219_v3 }
  0x4b   : > { %544 = vmatpush.msrb.mxu2 %v1471_v61  ;;  %631 = vmatpush.msrb.mxu3 %v630_v60  ;;  %v1623_v20 = vsub.f32 %v181_v11, %v1605_v7  ;;  %v1823_v60 = vand.u32 4294901760, %v1351_v54 }
  0x4c   : > { %466 = vmatpush.msrb.mxu0 %v1820_v9  ;;  %503 = vmatpush.msrb.mxu1 %v1195_v25  ;;  %v642_v25 = vand.u32 4294901760, %v641_v47  ;;  %v659_v47 = vsub.f32 %v1600_v53, %v658_v10 }
  0x4d   : > { %546 = vmatpush.msrb.mxu2 %v1486_v16  ;;  %637 = vmatpush.msrb.mxu3 %v636_v17  ;;  %v559_v11 = vand.u32 4294901760, %v1623_v20 }
  0x4e   : > { %470 = vmatpush.msrb.mxu0 %v1821_v52  ;;  %505 = vmatpush.msrb.mxu1 %v1202_v28  ;;  %v653_v28 = vsub.f32 %v1586_v38, %v652_v8 }
  0x4f   : > { %548 = vmatpush.msrb.mxu2 %v1501_v19  ;;  %643 = vmatpush.msrb.mxu3 %v642_v25 }
  0x50   : > { %474 = vmatpush.msrb.mxu0 %v1822_v40  ;;  %507 = vmatpush.msrb.mxu1 %v1223_v35  ;;  %v648_v35 = vand.u32 4294901760, %v647_v2  ;;  %v654_v54 = vand.u32 4294901760, %v653_v28 }
  0x51   : > { %550 = vmatpush.msrb.mxu2 %v1514_v55  ;;  %221 = vmatmul.f32.vlgmr.msra.gmra.mxu0 %v220_v30 }
  0x52   : > { %478 = vmatpush.msrb.mxu0 %v1823_v60  ;;  %509 = vmatpush.msrb.mxu1 %v1236_v41  ;;  %v660_v41 = vand.u32 4294901760, %v659_v47 }
  0x53   : > { %552 = vmatpush.msrb.mxu2 %v1543_v6  ;;  %649 = vmatpush.msrb.mxu3 %v648_v35 }
  0x54   : > { %482 = vmatpush.msrb.mxu0 %v1824_v42  ;;  %511 = vmatpush.msrb.mxu1 %v1261_v50  ;;  %v560_v50 = vsub.f32 %v1623_v20, %v559_v11 }
  0x55   : > { %554 = vmatpush.msrb.mxu2 %v1559_v34  ;;  %655 = vmatpush.msrb.mxu3 %v654_v54 }
  0x56   : > { %669 = vmatpush.msra.mxu0 %v1343_v44  ;;  %513 = vmatpush.msrb.mxu1 %v1279_v58  ;;  %v1825_v58 = vand.u32 4294901760, %v1343_v44  ;;  %v561_v56 = vand.u32 4294901760, %v560_v50  ;;  %v1827_v44 = vand.u32 4294901760, %v1385_v39 }
  0x57   : > { %376 = vmatmul.f32.vlgmr.msra.gmra.mxu2 %v1557_v14  ;;  %415 = vmatmul.f32.vlgmr.msra.gmra.mxu3 %v218_v37 }
  0x58   : > { %672 = vmatpush.msra.mxu0 %v1361_v57  ;;  %515 = vmatpush.msrb.mxu1 %v1294_v0  ;;  %v1826_v0 = vand.u32 4294901760, %v1361_v57  ;;  %v1829_v57 = vld [vmem:[#allocation5_spill] sm:$0xff] }
  0x59   : > { %556 = vmatpush.msrb.mxu2 %v1578_v46  ;;  %661 = vmatpush.msrb.mxu3 %v660_v41 }
  0x5a   : > { %675 = vmatpush.msra.mxu0 %v1385_v39  ;;  %517 = vmatpush.msrb.mxu1 %v1315_v26  ;;  %v1828_v26 = vand.u32 4294901760, %v1401_v59 }
  0x5b   : > { %763 = vmatpush.msra.mxu2 %v1825_v58  ;;  %322 = vmatmul.f32.vlgmr.msra.gmra.mxu1 %v1530_v21 }
  0x5c   : > { %678 = vmatpush.msra.mxu0 %v1401_v59  ;;  %830 = vmatpush.msra.mxu3 %v1309_v12  ;;  %v1831_v59 = vand.u32 4294901760, %v1439_v24 }
  0x5d   : > { %767 = vmatpush.msra.mxu2 %v1826_v0  ;;  %519 = vmatpush.msrb.mxu1 %v1322_v31  ;;  %v1833_v31 = vand.u32 4294901760, %v1461_v48 }
  0x5e   : > { %681 = vmatpush.msra.mxu0 %v1421_v33  ;;  %832 = vmatpush.msra.mxu3 %v1324_v32 }
  0x5f   : > { %722 = vmatpush.msra.mxu1 %v1309_v12  ;;  %771 = vmatpush.msra.mxu2 %v1827_v44  ;;  %v1830_v12 = vand.u32 4294901760, %v1421_v33  ;;  %v1832_v33 = vand.u32 4294901760, %v1445_v23 }
  0x60   : > { %562 = vmatmul.f32.vlgmr.msrb.gmra.mxu2 %v561_v56  ;;  %684 = vmatpush.msra.mxu0 %v1439_v24  ;;  %v1834_v24 = vand.u32 4294901760, %v1484_v15 }
  0x61   : > { %724 = vmatpush.msra.mxu1 %v1324_v32  ;;  %775 = vmatpush.msra.mxu2 %v1828_v26 }
  0x62   : > { %834 = vmatpush.msra.mxu3 %v1829_v57  ;;  %484 = vmatmul.f32.vlgmr.msrb.gmra.mxu0 %v1530_v21 }
  0x63   : > { %663 = vmatmul.f32.vlgmr.msrb.gmra.mxu3 %v1605_v7  ;;  %687 = vmatpush.msra.mxu0 %v1445_v23  ;;  %v1835_v23 = vand.u32 4294901760, %v1499_v45 }
  0x64   : > { %726 = vmatpush.msra.mxu1 %v1829_v57  ;;  %779 = vmatpush.msra.mxu2 %v1830_v12 }
  0x65   : > { %836 = vmatpush.msra.mxu3 %v1371_v13  ;;  %521 = vmatmul.f32.vlgmr.msrb.gmra.mxu1 %v1530_v21 }
  0x66   : > { %690 = vmatpush.msra.mxu0 %v1461_v48  ;;  %728 = vmatpush.msra.mxu1 %v1371_v13 }
  0x67   : > { %783 = vmatpush.msra.mxu2 %v1831_v59  ;;  %838 = vmatpush.msra.mxu3 %v1387_v43 }
  0x68   : > { %693 = vmatpush.msra.mxu0 %v1484_v15  ;;  %730 = vmatpush.msra.mxu1 %v1387_v43 }
  0x69   : > { %787 = vmatpush.msra.mxu2 %v1832_v33  ;;  %840 = vmatpush.msra.mxu3 %v1403_v51 }
  0x6a   : > { %696 = vmatpush.msra.mxu0 %v1499_v45  ;;  %732 = vmatpush.msra.mxu1 %v1403_v51 }
  0x6b   : > { %791 = vmatpush.msra.mxu2 %v1833_v31  ;;  %842 = vmatpush.msra.mxu3 %v1413_v62 }
  0x6c   : > { %699 = vmatpush.msra.mxu0 %v1512_v49  ;;  %734 = vmatpush.msra.mxu1 %v1413_v62 }
  0x6d   : > { %795 = vmatpush.msra.mxu2 %v1834_v24  ;;  %844 = vmatpush.msra.mxu3 %v1428_v27 }
  0x6e   : > { %702 = vmatpush.msra.mxu0 %v1528_v1  ;;  %736 = vmatpush.msra.mxu1 %v1428_v27 }
  0x6f   : > { %799 = vmatpush.msra.mxu2 %v1835_v23  ;;  %846 = vmatpush.msra.mxu3 %v1455_v22 }
  0x70   : > { %705 = vmatpush.msra.mxu0 %v1546_v29  ;;  %738 = vmatpush.msra.mxu1 %v1455_v22 }
  0x71   : > { %803 = vmatpush.msra.mxu2 %v628_v18  ;;  %848 = vmatpush.msra.mxu3 %v1471_v61 }
  0x72   : > { %708 = vmatpush.msra.mxu0 %v1573_v5  ;;  %740 = vmatpush.msra.mxu1 %v1471_v61 }
  0x73   : > { %807 = vmatpush.msra.mxu2 %v634_v4  ;;  %850 = vmatpush.msra.mxu3 %v1486_v16 }
  0x74   : > { %711 = vmatpush.msra.mxu0 %v1586_v38  ;;  %742 = vmatpush.msra.mxu1 %v1486_v16 }
  0x75   : > { %811 = vmatpush.msra.mxu2 %v640_v63  ;;  %852 = vmatpush.msra.mxu3 %v1501_v19 }
  0x76   : > { %714 = vmatpush.msra.mxu0 %v1600_v53  ;;  %744 = vmatpush.msra.mxu1 %v1501_v19 }
  0x77   : > { %815 = vmatpush.msra.mxu2 %v646_v36  ;;  %854 = vmatpush.msra.mxu3 %v1514_v55 }
  0x78   : > { %717 = vmatmul.f32.vlgmr.msra.gmra.mxu0 %v1623_v20  ;;  %746 = vmatpush.msra.mxu1 %v1514_v55  ;;  %v1059_v55 = vmov 0.0  }
  0x79   : > { %819 = vmatpush.msra.mxu2 %v652_v8  ;;  %856 = vmatpush.msra.mxu3 %v1543_v6  ;;  %143 = vst.msk [vmem:[%s1738_s7] sm:$0x3] %vm142_vm0, %v1059_v55 }
  0x7a   : > { %748 = vmatpush.msra.mxu1 %v1543_v6  ;;  %144 = vst.msk [vmem:[%s1738_s7 + $0x6] sm:$0x3] %vm142_vm0, %v1059_v55 }
  0x7b   : > { %823 = vmatpush.msra.mxu2 %v658_v10  ;;  %858 = vmatpush.msra.mxu3 %v1559_v34 }
  0x7c   : > { %825 = vmatmul.f32.vlgmr.msra.gmra.mxu2 %v1605_v7  ;;  %750 = vmatpush.msra.mxu1 %v1559_v34 }
  0x7d   : > { %860 = vmatpush.msra.mxu3 %v1578_v46 }
  0x7e   : > { %862 = vmatmul.f32.vlgmr.msra.gmra.mxu3 %v1605_v7  ;;  %752 = vmatpush.msra.mxu1 %v1578_v46 }
  0x7f   : > { %756 = vmatmul.f32.vlgmr.msra.gmra.mxu1 %v559_v11 }
  0xce   : > { %v222_v51 = vpop.f32.mrf.mxu0 }
  0xd8   : > { %v323_v27 = vpop.f32.mrf.mxu1 }
  0xd9   : > { %v324_v32 = vadd.f32 %v323_v27, %v222_v51 }
  0xda   : > { %v377_v39 = vpop.f32.mrf.mxu2  ;;  %v416_v43 = vpop.f32.mrf.mxu3 }
  0xdb   : > { %v378_v13 = vadd.f32 %v377_v39, %v324_v32 }
  0xdd   : > { %v417_v48 = vadd.f32 %v416_v43, %v378_v13 }
  0xdf   : > { %v485_v62 = vpop.f32.mrf.mxu0 }
  0xe0   : > { %v486_v22 = vadd.f32 %v485_v62, %v417_v48 }
  0xe2   : > { %v522_v15 = vpop.f32.mrf.mxu1 }
  0xe3   : > { %v523_v61 = vadd.f32 %v522_v15, %v486_v22  ;;  %v563_v45 = vpop.f32.mrf.mxu2 }
  0xe5   : > { %v564_v16 = vadd.f32 %v563_v45, %v523_v61 }
  0xe6   : > { %v664_v19 = vpop.f32.mrf.mxu3 }
  0xe7   : > { %v665_v49 = vadd.f32 %v664_v19, %v564_v16 }
  0xf5   : > { %v718_v14 = vpop.f32.mrf.mxu0 }
  0xf6   : > { %v719_v1 = vadd.f32 %v718_v14, %v665_v49 }
  0xfc   : > { %v757_v21 = vpop.f32.mrf.mxu1 }
  0xfd   : > { %v758_v18 = vadd.f32 %v757_v21, %v719_v1 }
  0xff   : > { %v826_v6 = vpop.f32.mrf.mxu2 }
 0x100   : > { %v827_v29 = vadd.f32 %v826_v6, %v758_v18 }
 0x101   : > { %v863_v4 = vpop.f32.mrf.mxu3 }
 0x102   : > { %v864_v34 = vadd.f32 %v863_v4, %v827_v29 }
 0x104   : > { %867 = vst.msk [vmem:[%s1738_s7 + $0x2] sm:$0xf] %vm866_vm1, %v864_v34 }
 0x105   : > { %1022 = shalt.err (!%p1019_p3)
}
 0x106   : > { %955 = dma.vmem_to_hbm [thread:$0]  (%p1113_p5), %s882_s21, 128, %s884_s22, %s869_s13  }
 0x107 PF: > { %p961_p4 = scmp.ge.s32.totalorder %s1057_s12, 2  ;;  %s895_s30 = sand.u32 1, %s1045_s9  }
 0x108   : > { %s896_s3 = scalar_lea.sflag [#allocation3], %s895_s30 }
 0x109   : > { %p958_p7 = pnand %p961_p4, %p1117_p6 }
 0x10b   : > { %p959_p8 = pneg %p958_p7 }
 0x10d   : > { %1040 = dma.done.wait (%p959_p8), %s896_s3, 128  }
 0x10e   : > { %1042 = vsyncadd (%p959_p8), %s896_s3, 4294967168  ;;  %p12_p9 = scmp.ge.s32.totalorder %s1100_s15, 4   ;;  %s1836_s9 = smov %s1049_s10 }
 0x10f   : > { %s1837_s10 = smov %s1053_s11  ;;  %s1838_s11 = smov %s1111_s18 }
 0x110   : > { %s1839_s12 = smov %s1100_s15  ;;  %14 = sbr.rel (!%p12_p9) target bundleno = 3 (0x3), region = 63 }
 0x115   :  { %902 = vsyncpa [#allocation3], 1 }
 0x116   :  { %904 = vsyncpa [#allocation3 + $0x1], 1 }

</bundles_post_ra>
